<compile_context>
chip_gen: v5e
topology: v5e:2x2
jax: 0.10.0
libtpu: 0.0.40
codegen_flags: <defaults>
</compile_context>

<pallas_src>
import jax
import jax.numpy as jnp
from jax.experimental import pallas as pl
from jax.experimental.pallas import tpu as pltpu


def actor_critic_kernel(x_ref, w1_ref, b1_ref, w2_ref, b2_ref, w3_ref, b3_ref, out_ref):
    """One batch tile: 3 fused (actor|critic) matmuls + ReLUs, lane-dense output."""
    x = x_ref[...]                                                     # [TB, S]

    h = jnp.dot(x, w1_ref[...], preferred_element_type=jnp.float32) + b1_ref[...]
    h = jnp.maximum(h, 0.0)                                            # [TB, 2H]

    h = jnp.dot(h, w2_ref[...], preferred_element_type=jnp.float32) + b2_ref[...]
    h = jnp.maximum(h, 0.0)                                            # [TB, 2H]

    y = jnp.dot(h, w3_ref[...], preferred_element_type=jnp.float32) + b3_ref[...]
    out_ref[...] = y.astype(out_ref.dtype)                             # [TB, OUT_PAD]


def pack_params(p, state_dim, action_dim, hidden_dim, weight_dtype=jnp.float32):
    """Fuse actor/critic weights into 3 block-diagonal matrices + 3 bias rows.

    weight_dtype=jnp.bfloat16 halves weight DMA (f32 accumulation is kept via
    preferred_element_type), at the cost of bf16 weight rounding.
    """
    H = hidden_dim
    out_dim = action_dim + 1
    out_pad = 128 * pl.cdiv(out_dim, 128)        # lane-dense output width

    # Layer 1: [state_dim, 2H] = [wa1 | wc1]
    w1 = jnp.concatenate([p["wa1"], p["wc1"]], axis=1)
    b1 = jnp.concatenate([p["ba1"], p["bc1"]], axis=1)                 # [1, 2H]

    # Layer 2: block-diagonal [2H, 2H]
    w2 = jnp.zeros((2 * H, 2 * H), jnp.float32)
    w2 = w2.at[:H, :H].set(p["wa2"]).at[H:, H:].set(p["wc2"])
    b2 = jnp.concatenate([p["ba2"], p["bc2"]], axis=1)                 # [1, 2H]

    # Layer 3: block-structured [2H, out_pad]; cols [0:action_dim]=actor,
    # col action_dim = critic value, rest zero padding.
    w3 = jnp.zeros((2 * H, out_pad), jnp.float32)
    w3 = w3.at[:H, :action_dim].set(p["wa3"])
    w3 = w3.at[H:, action_dim:action_dim + 1].set(p["wc3"])
    b3 = jnp.zeros((1, out_pad), jnp.float32)
    b3 = b3.at[:, :action_dim].set(p["ba3"])
    b3 = b3.at[:, action_dim:action_dim + 1].set(p["bc3"])

    return dict(
        w1=w1.astype(weight_dtype), b1=b1,
        w2=w2.astype(weight_dtype), b2=b2,
        w3=w3.astype(weight_dtype), b3=b3,
        state_dim=state_dim, action_dim=action_dim,
        hidden_dim=H, out_pad=int(out_pad),
    )


def actor_critic_forward(state, packed, *, tile_b=128):
    """state: [B, state_dim] f32. packed: output of pack_params."""
    B, state_dim = state.shape
    H2 = 2 * packed["hidden_dim"]
    action_dim = packed["action_dim"]
    out_pad = packed["out_pad"]

    # Pad batch to a multiple of the tile so the grid divides evenly.
    n_tiles = pl.cdiv(B, tile_b)
    B_pad = n_tiles * tile_b
    if B_pad != B:
        state = jnp.pad(state, ((0, B_pad - B), (0, 0)))

    # Weights/biases: index_map always returns block (0, 0) -> loaded once,
    # VMEM-resident across all batch-tile grid steps.
    const = lambda i: (0, 0)
    in_specs = [
        pl.BlockSpec((tile_b, state_dim), lambda i: (i, 0)),   # state tile
        pl.BlockSpec((state_dim, H2), const),                  # w1
        pl.BlockSpec((1, H2), const),                          # b1
        pl.BlockSpec((H2, H2), const),                         # w2
        pl.BlockSpec((1, H2), const),                          # b2
        pl.BlockSpec((H2, out_pad), const),                    # w3
        pl.BlockSpec((1, out_pad), const),                     # b3
    ]
    out_specs = pl.BlockSpec((tile_b, out_pad), lambda i: (i, 0))

    out = pl.pallas_call(
        actor_critic_kernel,
        out_shape=jax.ShapeDtypeStruct((B_pad, out_pad), jnp.float32),
        grid=(n_tiles,),
        in_specs=in_specs,
        out_specs=out_specs,
        compiler_params=pltpu.CompilerParams(
            dimension_semantics=("parallel",),
        ),
    )(
        state,
        packed["w1"], packed["b1"],
        packed["w2"], packed["b2"],
        packed["w3"], packed["b3"],
    )

    action_mean = out[:B, :action_dim]
    value = out[:B, action_dim:action_dim + 1]
    return action_mean, value


def init_params(key, state_dim, action_dim, hidden_dim):
    """Deterministic synthetic init (PyTorch-Linear-style uniform bounds)."""
    def linear(key, fan_in, fan_out):
        kw, kb = jax.random.split(key)
        bound = 1.0 / jnp.sqrt(fan_in)
        w = jax.random.uniform(kw, (fan_in, fan_out), jnp.float32, -bound, bound)
        b = jax.random.uniform(kb, (1, fan_out), jnp.float32, -bound, bound)
        return w, b

    keys = jax.random.split(key, 6)
    wa1, ba1 = linear(keys[0], state_dim, hidden_dim)
    wa2, ba2 = linear(keys[1], hidden_dim, hidden_dim)
    wa3, ba3 = linear(keys[2], hidden_dim, action_dim)
    wc1, bc1 = linear(keys[3], state_dim, hidden_dim)
    wc2, bc2 = linear(keys[4], hidden_dim, hidden_dim)
    wc3, bc3 = linear(keys[5], hidden_dim, 1)
    return dict(
        wa1=wa1, ba1=ba1, wa2=wa2, ba2=ba2, wa3=wa3, ba3=ba3,
        wc1=wc1, bc1=bc1, wc2=wc2, bc2=bc2, wc3=wc3, bc3=bc3,
    )


def reference_forward(state, p):
    """Pure-JAX reference mirroring the PyTorch module exactly."""
    h = jnp.maximum(state @ p["wa1"] + p["ba1"], 0.0)
    h = jnp.maximum(h @ p["wa2"] + p["ba2"], 0.0)
    action_mean = h @ p["wa3"] + p["ba3"]
    g = jnp.maximum(state @ p["wc1"] + p["bc1"], 0.0)
    g = jnp.maximum(g @ p["wc2"] + p["bc2"], 0.0)
    value = g @ p["wc3"] + p["bc3"]
    return action_mean, value


if __name__ == "__main__":
    # Large batch (stacked envs / timesteps) so the MXU rows are filled and the
    # launch + weight DMA are amortized over the grid of batch tiles.
    B, state_dim, action_dim, hidden_dim = 512, 4, 2, 128

    key = jax.random.PRNGKey(0)
    k_params, k_state = jax.random.split(key)
    params = init_params(k_params, state_dim, action_dim, hidden_dim)
    # Pack once (per parameter update in a real rollout loop), reuse every step.
    packed = pack_params(params, state_dim, action_dim, hidden_dim,
                         weight_dtype=jnp.float32)
    state = jax.random.normal(k_state, (B, state_dim), jnp.float32)

    action_mean, value = actor_critic_forward(state, packed, tile_b=128)
    jax.block_until_ready((action_mean, value))

    ref_a, ref_v = reference_forward(state, params)
    assert action_mean.shape == (B, action_dim)
    assert value.shape == (B, 1)
    assert jnp.allclose(action_mean, ref_a, atol=1e-4, rtol=1e-4)
    assert jnp.allclose(value, ref_v, atol=1e-4, rtol=1e-4)

    print("KERNEL_OK")
</pallas_src>

<mosaic_0001>
module attributes {stable_mosaic.version = 11 : i64} {
  func.func @actor_critic_kernel(%arg0: i32, %arg1: memref<128x4xf32, #tpu.memory_space<vmem>>, %arg2: memref<4x256xf32, #tpu.memory_space<vmem>>, %arg3: memref<1x256xf32, #tpu.memory_space<vmem>>, %arg4: memref<256x256xf32, #tpu.memory_space<vmem>>, %arg5: memref<1x256xf32, #tpu.memory_space<vmem>>, %arg6: memref<256x128xf32, #tpu.memory_space<vmem>>, %arg7: memref<1x128xf32, #tpu.memory_space<vmem>>, %arg8: memref<128x128xf32, #tpu.memory_space<vmem>>) attributes {dimension_semantics = [#tpu.dimension_semantics<parallel>], iteration_bounds = array<i64: 4>, scalar_prefetch = 0 : i64, scratch_operands = 0 : i64, tpu.core_type = #tpu.core_type<tc>, window_params = [{transform_indices = @transform_0, window_bounds = array<i64: 128, 4>}, {pipeline_mode = #tpu.pipeline_mode<synchronous>, transform_indices = @transform_1, window_bounds = array<i64: 4, 256>}, {pipeline_mode = #tpu.pipeline_mode<synchronous>, transform_indices = @transform_2, window_bounds = array<i64: 1, 256>}, {pipeline_mode = #tpu.pipeline_mode<synchronous>, transform_indices = @transform_3, window_bounds = array<i64: 256, 256>}, {pipeline_mode = #tpu.pipeline_mode<synchronous>, transform_indices = @transform_4, window_bounds = array<i64: 1, 256>}, {pipeline_mode = #tpu.pipeline_mode<synchronous>, transform_indices = @transform_5, window_bounds = array<i64: 256, 128>}, {pipeline_mode = #tpu.pipeline_mode<synchronous>, transform_indices = @transform_6, window_bounds = array<i64: 1, 128>}, {transform_indices = @transform_7, window_bounds = array<i64: 128, 128>}]} {
    %c0 = arith.constant 0 : index
    %c0_0 = arith.constant 0 : index
    %0 = vector.load %arg1[%c0, %c0_0] : memref<128x4xf32, #tpu.memory_space<vmem>>, vector<128x4xf32>
    %c0_1 = arith.constant 0 : index
    %c0_2 = arith.constant 0 : index
    %1 = vector.load %arg2[%c0_1, %c0_2] : memref<4x256xf32, #tpu.memory_space<vmem>>, vector<4x256xf32>
    %cst = arith.constant dense<0.000000e+00> : vector<128x256xf32>
    %2 = tpu.matmul %0, %1, %cst {dimension_numbers = #tpu.dot_dimension_numbers<[1], [0], [0], [1], [0, 0, 1, 1], [], []>} : vector<128x4xf32>, vector<4x256xf32>, vector<128x256xf32> -> vector<128x256xf32>
    %c0_3 = arith.constant 0 : index
    %c0_4 = arith.constant 0 : index
    %3 = vector.load %arg3[%c0_3, %c0_4] : memref<1x256xf32, #tpu.memory_space<vmem>>, vector<1x256xf32>
    %4 = vector.broadcast %3 : vector<1x256xf32> to vector<128x256xf32>
    %5 = arith.addf %2, %4 : vector<128x256xf32>
    %cst_5 = arith.constant 0.000000e+00 : f32
    %6 = vector.broadcast %cst_5 : f32 to vector<128x256xf32>
    %7 = arith.maximumf %5, %6 : vector<128x256xf32>
    %c0_6 = arith.constant 0 : index
    %c0_7 = arith.constant 0 : index
    %8 = vector.load %arg4[%c0_6, %c0_7] : memref<256x256xf32, #tpu.memory_space<vmem>>, vector<256x256xf32>
    %cst_8 = arith.constant dense<0.000000e+00> : vector<128x256xf32>
    %9 = tpu.matmul %7, %8, %cst_8 {dimension_numbers = #tpu.dot_dimension_numbers<[1], [0], [0], [1], [0, 0, 1, 1], [], []>} : vector<128x256xf32>, vector<256x256xf32>, vector<128x256xf32> -> vector<128x256xf32>
    %c0_9 = arith.constant 0 : index
    %c0_10 = arith.constant 0 : index
    %10 = vector.load %arg5[%c0_9, %c0_10] : memref<1x256xf32, #tpu.memory_space<vmem>>, vector<1x256xf32>
    %11 = vector.broadcast %10 : vector<1x256xf32> to vector<128x256xf32>
    %12 = arith.addf %9, %11 : vector<128x256xf32>
    %cst_11 = arith.constant 0.000000e+00 : f32
    %13 = vector.broadcast %cst_11 : f32 to vector<128x256xf32>
    %14 = arith.maximumf %12, %13 : vector<128x256xf32>
    %c0_12 = arith.constant 0 : index
    %c0_13 = arith.constant 0 : index
    %15 = vector.load %arg6[%c0_12, %c0_13] : memref<256x128xf32, #tpu.memory_space<vmem>>, vector<256x128xf32>
    %cst_14 = arith.constant dense<0.000000e+00> : vector<128x128xf32>
    %16 = tpu.matmul %14, %15, %cst_14 {dimension_numbers = #tpu.dot_dimension_numbers<[1], [0], [0], [1], [0, 0, 1, 1], [], []>} : vector<128x256xf32>, vector<256x128xf32>, vector<128x128xf32> -> vector<128x128xf32>
    %c0_15 = arith.constant 0 : index
    %c0_16 = arith.constant 0 : index
    %17 = vector.load %arg7[%c0_15, %c0_16] : memref<1x128xf32, #tpu.memory_space<vmem>>, vector<1x128xf32>
    %18 = vector.broadcast %17 : vector<1x128xf32> to vector<128x128xf32>
    %19 = arith.addf %16, %18 : vector<128x128xf32>
    %c0_17 = arith.constant 0 : index
    %c0_18 = arith.constant 0 : index
    %20 = vector.load %arg8[%c0_17, %c0_18] : memref<128x128xf32, #tpu.memory_space<vmem>>, vector<128x128xf32>
    tpu.vector_store %arg8[%c0_17, %c0_18], %19 {strides = array<i32>} : memref<128x128xf32, #tpu.memory_space<vmem>>, vector<128x128xf32>,
    return
  }
  func.func @transform_0(%arg0: i32) -> (i32, i32) {
    %c0_i32 = arith.constant 0 : i32
    %c0_i32_0 = arith.constant 0 : i32
    return %arg0, %c0_i32 : i32, i32
  }
  func.func @transform_1(%arg0: i32) -> (i32, i32) {
    %c0_i32 = arith.constant 0 : i32
    %c0_i32_0 = arith.constant 0 : i32
    %c0_i32_1 = arith.constant 0 : i32
    return %c0_i32, %c0_i32_0 : i32, i32
  }
  func.func @transform_2(%arg0: i32) -> (i32, i32) {
    %c0_i32 = arith.constant 0 : i32
    %c0_i32_0 = arith.constant 0 : i32
    %c0_i32_1 = arith.constant 0 : i32
    return %c0_i32, %c0_i32_0 : i32, i32
  }
  func.func @transform_3(%arg0: i32) -> (i32, i32) {
    %c0_i32 = arith.constant 0 : i32
    %c0_i32_0 = arith.constant 0 : i32
    %c0_i32_1 = arith.constant 0 : i32
    return %c0_i32, %c0_i32_0 : i32, i32
  }
  func.func @transform_4(%arg0: i32) -> (i32, i32) {
    %c0_i32 = arith.constant 0 : i32
    %c0_i32_0 = arith.constant 0 : i32
    %c0_i32_1 = arith.constant 0 : i32
    return %c0_i32, %c0_i32_0 : i32, i32
  }
  func.func @transform_5(%arg0: i32) -> (i32, i32) {
    %c0_i32 = arith.constant 0 : i32
    %c0_i32_0 = arith.constant 0 : i32
    %c0_i32_1 = arith.constant 0 : i32
    return %c0_i32, %c0_i32_0 : i32, i32
  }
  func.func @transform_6(%arg0: i32) -> (i32, i32) {
    %c0_i32 = arith.constant 0 : i32
    %c0_i32_0 = arith.constant 0 : i32
    %c0_i32_1 = arith.constant 0 : i32
    return %c0_i32, %c0_i32_0 : i32, i32
  }
  func.func @transform_7(%arg0: i32) -> (i32, i32) {
    %c0_i32 = arith.constant 0 : i32
    %c0_i32_0 = arith.constant 0 : i32
    return %arg0, %c0_i32 : i32, i32
  }
}

</mosaic_0001>

<bundles_post_ra>
// kernel: tpu_custom_call.1
= control target key start
LH: loop header
LB: loop body
LE: loop exit
PB: predicated region body
PF: predicated region fallthrough
CT: control target
= control target key end

     0   :  { %12 = vsyncpa [#allocation3], 0  ;;  %s1914_s0 = inlined_call_operand.vmem [shape: f32[512,4], index: 0, kind: input, shape index: {}]   ;;  %s1915_s1 = inlined_call_operand.vmem [shape: f32[4,256], index: 1, kind: input, shape index: {}]   ;;  %s1916_s2 = inlined_call_operand.vmem [shape: f32[1,256], index: 2, kind: input, shape index: {}]   ;;  %s1917_s3 = inlined_call_operand.vmem [shape: f32[256,256], index: 3, kind: input, shape index: {}]   ;;  %s1918_s4 = inlined_call_operand.vmem [shape: f32[1,256], index: 4, kind: input, shape index: {}]   ;;  %s1919_s5 = inlined_call_operand.hbm [shape: f32[256,128], index: 5, kind: input, shape index: {}]   ;;  %s1920_s6 = inlined_call_operand.vmem [shape: f32[1,128], index: 6, kind: input, shape index: {}]   ;;  %s1921_s7 = inlined_call_operand.hbm [shape: f32[512,128], index: 7, kind: output, shape index: {}]  }
   0x1   :  { %13 = vsyncpa [#allocation4], 0 }
   0x2   :  { %15 = vsyncpa [#allocation4 + $0x1], 0  ;;  %s1453_s24 = smov 0   ;;  %s1455_s25 = smov 0  }
   0x3   :  { %s1457_s26 = smov 0   ;;  %s1459_s27 = smov 0  }
   0x4 LB: > { %s1474_s28 = sadd.s32 4294967295, %s1406_s27   ;;  %s1174_s29 = sadd.s32 4294967294, %s1406_s27   ;;  %s1406_s27 = sphi %s1459_s27, %s1927_s27   ;;  %s1402_s26 = sphi %s1457_s26, %s1926_s26   ;;  %s1398_s25 = sphi %s1455_s25, %s1925_s25   ;;  %s1394_s24 = sphi %s1453_s24, %s1924_s24  }
   0x5   : > { %s1478_s30 = sadd.s32 1, %s1406_s27   ;;  %s180_s8 = sadd.s32 1, %s1402_s26 }
   0x6   : > { %s177_s9 = ssub.s32 %s1406_s27, %s1478_s30  ;;  %p190_p0 = scmp.ne.s32.totalorder %s1402_s26, %s1398_s25 }
   0x7   : > { %p178_p1 = scmp.eq.s32.totalorder %s177_s9, 0  ;;  %p191_p2 = scmp.eq.s32.totalorder %s1474_s28, 3 }
   0x8   : > { %p196_p3 = scmp.ne.s32.totalorder %s1398_s25, %s1394_s24  ;;  %p197_p4 = scmp.eq.s32.totalorder %s1174_s29, 3 }
   0x9   : > { %s1489_s10 = scalar_select %p178_p1, %s1402_s26, %s180_s8  }
   0xa   : > { %p1491_p5 = por %p191_p2, %p190_p0  ;;  %p1495_p6 = por %p197_p4, %p196_p3 }
   0xb   : > { %p1175_p7 = scmp.ge.s32.totalorder %s1406_s27, 1  ;;  %p204_p8 = scmp.lt.s32.totalorder %s1406_s27, 5 }
   0xc   : > { %p1269_p9 = scmp.eq.s32.totalorder %s1474_s28, 0  ;;  %s227_s15 = sshll.u32 %s1919_s5, 4  ;;  %s228_s15 = int_to_ptr.hbm [resolvable:$true] %s227_s15 }
   0xd   : > { %p205_p10 = pnand %p1175_p7, %p204_p8  ;;  %s1408_s16 = smov [#allocation2]  }
   0xe   : > { %s229_s17 = sshll.u32 %s1408_s16, 4  ;;  %s1409_s18 = smov 128   ;;  %s230_s17 = int_to_ptr.vmem [resolvable:$true] %s229_s17 }
   0xf   : > { %p1261_p11 = pneg %p205_p10  ;;  %s1410_s19 = smov 8  }
  0x10   : > { %257 = sbr.rel (%p205_p10) target bundleno = 560 (0x230), region = 48 }
  0x11   : > { %p1262_p12 = pnand %p1269_p9, %p1261_p11 }
  0x13   : > { %1264 = dma.hbm_to_vmem [thread:$0]  (!%p1262_p12), %s228_s15, 4096, %s230_s17, [#allocation3], %s1409_s18, %s1409_s18, %s1410_s19  }
  0x15   : > { %1385 = dma.done.wait (%p1269_p9), [#allocation3], 4096  }
  0x16   : > { %1387 = vsyncadd (%p1269_p9), [#allocation3], 4294963200  ;;  %s1181_s20 = sshll.u32 %s1474_s28, 4  ;;  %v313_v0 = vld [vmem:[%s1915_s1] sm:$0xff]  ;;  %vm373_vm0 = vcmask 1043456   ;;  %vm324_vm1 = vcmask 31744  }
  0x17   : > { %p291_p13 = scmp.lt.s32.totalorder %s1181_s20, 63  ;;  %321 = vst [vmem:[#allocation1] ss:$2 sm:$0xff] %v313_v0  ;;  %v571_v2 = vld [vmem:[%s1917_s3 + $0xf8] sm:$0xff]  ;;  %v569_v6 = vld [vmem:[%s1917_s3 + $0xe8] sm:$0xff]  ;;  %v570_v35 = vld [vmem:[%s1917_s3 + $0xf0] sm:$0xff] }
  0x18   : > { %v603_v3 = vld [vmem:[%s1917_s3 + $0x1f8] sm:$0xff]  ;;  %v601_v7 = vld [vmem:[%s1917_s3 + $0x1e8] sm:$0xff]  ;;  %610 = vmatpush.msra.mxu2 %v570_v35  ;;  %v568_v37 = vld [vmem:[%s1917_s3 + $0xe0] sm:$0xff]  ;;  %s287_s14 = sand.u32 1, %s1398_s25   ;;  %s1222_s19 = sshll.u32 %s1474_s28, 7 }
  0x19   : > { %s1929_s20 = smov (!%p291_p13, %s1181_s20), 63  ;;  %v567_v8 = vld [vmem:[%s1917_s3 + $0xd8] sm:$0xff]  ;;  %v565_v10 = vld [vmem:[%s1917_s3 + $0xc8] sm:$0xff]  ;;  %v602_v38 = vld [vmem:[%s1917_s3 + $0x1f0] sm:$0xff]  ;;  %s1180_s17 = sshll.u32 %s287_s14, 7 }
  0x1a   : > { %s1182_s23 = sshll.u32 %s1929_s20, 3  ;;  %v599_v9 = vld [vmem:[%s1917_s3 + $0x1d8] sm:$0xff]  ;;  %v597_v11 = vld [vmem:[%s1917_s3 + $0x1c8] sm:$0xff]  ;;  %675 = vmatpush.msra.mxu3 %v602_v38  ;;  %v566_v39 = vld [vmem:[%s1917_s3 + $0xd0] sm:$0xff]  ;;  %611 = vmatpush.msra.mxu2 %v568_v37  ;;  %s1847_s18 = scalar_lea.vmem [#allocation5], %s1180_s17 }
  0x1b   : > { %s1518_s9 = scalar_lea.vmem %s1914_s0, %s1182_s23  ;;  %v563_v13 = vld [vmem:[%s1917_s3 + $0xb8] sm:$0xff]  ;;  %v561_v16 = vld [vmem:[%s1917_s3 + $0xa8] sm:$0xff]  ;;  %v600_v40 = vld [vmem:[%s1917_s3 + $0x1e0] sm:$0xff]  ;;  %s1096_s22 = scalar_lea.hbm %s1921_s7, %s1222_s19 }
  0x1c   : > { %v297_v1 = vld [vmem:[%s1518_s9] sm:$0xff]  ;;  %v298_v12 = vld [vmem:[%s1518_s9 + $0x8] sm:$0xff]  ;;  %v595_v14 = vld [vmem:[%s1917_s3 + $0x1b8] sm:$0xff]  ;;  %676 = vmatpush.msra.mxu3 %v600_v40  ;;  %612 = vmatpush.msra.mxu2 %v566_v39  ;;  %s1097_s23 = sshll.u32 %s1847_s18, 4  ;;  %s1099_s29 = sshll.u32 %s1096_s22, 4  ;;  %s1098_s23 = int_to_ptr.vmem [resolvable:$true] %s1097_s23  ;;  %s1100_s29 = int_to_ptr.hbm [resolvable:$true] %s1099_s29 }
  0x1d   : > { %v299_v15 = vld [vmem:[%s1518_s9 + $0x10] sm:$0xff]  ;;  %v593_v17 = vld [vmem:[%s1917_s3 + $0x1a8] sm:$0xff]  ;;  %v300_v18 = vld [vmem:[%s1518_s9 + $0x18] sm:$0xff]  ;;  %s1085_s8 = scalar_lea.sflag [#allocation4], %s287_s14  ;;  %s1354_s28 = sshra.s32 %s1100_s29, 4  ;;  %s1355_s28 = int_to_ptr.hbm [resolvable:$true] %s1354_s28 }
  0x1e   : > { %v322_v4 = vld.sshfl [vmem:[#allocation1] sm:$0xff pattern:$0x75316420]  ;;  %v323_v5 = vld.sshfl [vmem:[#allocation1 + $0x8] sm:$0xff pattern:$0x75316420]  ;;  %p1361_p3 = scmp.lt.s32.totalorder %s1355_s28, %s1921_s7 }
  0x1f   : > { %1183 = vmatpush.msk.msra.mxu0 %vm373_vm0, %v322_v4  ;;  %1200 = vmatpush.msk.msra.mxu1 %vm373_vm0, %v323_v5  ;;  %v559_v19 = vld [vmem:[%s1917_s3 + $0x98] sm:$0xff]  ;;  %v301_v21 = vld [vmem:[%s1518_s9 + $0x20] sm:$0xff]  ;;  %v557_v22 = vld [vmem:[%s1917_s3 + $0x88] sm:$0xff]  ;;  %s1360_s16 = scalar_lea.hbm %s1921_s7, 512 }
  0x20   : > { %1184 = vmatmul.msk.f32.vlgmr.msra.gmra.mxu0 %vm324_vm1, %v297_v1  ;;  %1201 = vmatmul.msk.f32.vlgmr.msra.gmra.mxu1 %vm324_vm1, %v297_v1  ;;  %v591_v20 = vld [vmem:[%s1917_s3 + $0x198] sm:$0xff]  ;;  %v589_v23 = vld [vmem:[%s1917_s3 + $0x188] sm:$0xff]  ;;  %v303_v27 = vld [vmem:[%s1518_s9 + $0x30] sm:$0xff] }
  0x21   : > { %740 = vmatpush.msrb.mxu0 %v571_v2  ;;  %805 = vmatpush.msrb.mxu1 %v603_v3  ;;  %v302_v24 = vld [vmem:[%s1518_s9 + $0x28] sm:$0xff]  ;;  %v555_v25 = vld [vmem:[%s1917_s3 + $0x78] sm:$0xff]  ;;  %v305_v33 = vld [vmem:[%s1518_s9 + $0x40] sm:$0xff] }
  0x22   : > { %v587_v26 = vld [vmem:[%s1917_s3 + $0x178] sm:$0xff]  ;;  %v553_v28 = vld [vmem:[%s1917_s3 + $0x68] sm:$0xff]  ;;  %v564_v42 = vld [vmem:[%s1917_s3 + $0xc0] sm:$0xff] }
  0x23   : > { %741 = vmatpush.msrb.mxu0 %v569_v6  ;;  %806 = vmatpush.msrb.mxu1 %v601_v7  ;;  %v585_v29 = vld [vmem:[%s1917_s3 + $0x168] sm:$0xff]  ;;  %v304_v30 = vld [vmem:[%s1518_s9 + $0x38] sm:$0xff]  ;;  %v598_v43 = vld [vmem:[%s1917_s3 + $0x1d0] sm:$0xff] }
  0x24   : > { %v551_v31 = vld [vmem:[%s1917_s3 + $0x58] sm:$0xff]  ;;  %v549_v34 = vld [vmem:[%s1917_s3 + $0x48] sm:$0xff]  ;;  %613 = vmatpush.msra.mxu2 %v564_v42  ;;  %677 = vmatpush.msra.mxu3 %v598_v43  ;;  %v562_v45 = vld [vmem:[%s1917_s3 + $0xb0] sm:$0xff] }
  0x25   : > { %742 = vmatpush.msrb.mxu0 %v567_v8  ;;  %807 = vmatpush.msrb.mxu1 %v599_v9  ;;  %v583_v32 = vld [vmem:[%s1917_s3 + $0x158] sm:$0xff]  ;;  %v581_v36 = vld [vmem:[%s1917_s3 + $0x148] sm:$0xff]  ;;  %v596_v46 = vld [vmem:[%s1917_s3 + $0x1c0] sm:$0xff] }
  0x26   : > { %v306_v41 = vld [vmem:[%s1518_s9 + $0x48] sm:$0xff]  ;;  %v547_v44 = vld [vmem:[%s1917_s3 + $0x38] sm:$0xff]  ;;  %v560_v48 = vld [vmem:[%s1917_s3 + $0xa0] sm:$0xff]  ;;  %614 = vmatpush.msra.mxu2 %v562_v45  ;;  %678 = vmatpush.msra.mxu3 %v596_v46 }
  0x27   : > { %743 = vmatpush.msrb.mxu0 %v565_v10  ;;  %808 = vmatpush.msrb.mxu1 %v597_v11  ;;  %v579_v47 = vld [vmem:[%s1917_s3 + $0x138] sm:$0xff]  ;;  %v594_v49 = vld [vmem:[%s1917_s3 + $0x1b0] sm:$0xff]  ;;  %v592_v51 = vld [vmem:[%s1917_s3 + $0x1a0] sm:$0xff] }
  0x28   : > { %1185 = vmatmul.msk.f32.gmra.mxu0 %vm324_vm1, %v298_v12  ;;  %1202 = vmatmul.msk.f32.gmra.mxu1 %vm324_vm1, %v298_v12  ;;  %v558_v50 = vld [vmem:[%s1917_s3 + $0x90] sm:$0xff]  ;;  %v556_v53 = vld [vmem:[%s1917_s3 + $0x80] sm:$0xff]  ;;  %v545_v55 = vld [vmem:[%s1917_s3 + $0x28] sm:$0xff] }
  0x29   : > { %744 = vmatpush.msrb.mxu0 %v563_v13  ;;  %809 = vmatpush.msrb.mxu1 %v595_v14  ;;  %v307_v52 = vld [vmem:[%s1518_s9 + $0x50] sm:$0xff]  ;;  %v588_v57 = vld [vmem:[%s1917_s3 + $0x180] sm:$0xff]  ;;  %v577_v58 = vld [vmem:[%s1917_s3 + $0x128] sm:$0xff] }
  0x2a   : > { %615 = vmatpush.msra.mxu2 %v560_v48  ;;  %679 = vmatpush.msra.mxu3 %v594_v49  ;;  %v590_v54 = vld [vmem:[%s1917_s3 + $0x190] sm:$0xff]  ;;  %v552_v59 = vld [vmem:[%s1917_s3 + $0x60] sm:$0xff]  ;;  %v308_v63 = vld [vmem:[%s1518_s9 + $0x58] sm:$0xff] }
  0x2b   : > { %745 = vmatpush.msrb.mxu0 %v561_v16  ;;  %810 = vmatpush.msrb.mxu1 %v593_v17  ;;  %v554_v56 = vld [vmem:[%s1917_s3 + $0x70] sm:$0xff]  ;;  %v584_v62 = vld [vmem:[%s1917_s3 + $0x160] sm:$0xff]  ;;  %v543_v2 = vld [vmem:[%s1917_s3 + $0x18] sm:$0xff] }
  0x2c   : > { %616 = vmatpush.msra.mxu2 %v558_v50  ;;  %680 = vmatpush.msra.mxu3 %v592_v51  ;;  %v586_v60 = vld [vmem:[%s1917_s3 + $0x170] sm:$0xff]  ;;  %v548_v0 = vld [vmem:[%s1917_s3 + $0x40] sm:$0xff]  ;;  %v575_v5 = vld [vmem:[%s1917_s3 + $0x118] sm:$0xff] }
  0x2d   : > { %746 = vmatpush.msrb.mxu0 %v559_v19  ;;  %811 = vmatpush.msrb.mxu1 %v591_v20  ;;  %v550_v61 = vld [vmem:[%s1917_s3 + $0x50] sm:$0xff]  ;;  %v580_v4 = vld [vmem:[%s1917_s3 + $0x140] sm:$0xff]  ;;  %v541_v13 = vld [vmem:[%s1917_s3 + $0x8] sm:$0xff] }
  0x2e   : > { %617 = vmatpush.msra.mxu2 %v556_v53  ;;  %681 = vmatpush.msra.mxu3 %v590_v54  ;;  %v582_v1 = vld [vmem:[%s1917_s3 + $0x150] sm:$0xff]  ;;  %v544_v6 = vld [vmem:[%s1917_s3 + $0x20] sm:$0xff]  ;;  %v310_v16 = vld [vmem:[%s1518_s9 + $0x68] sm:$0xff] }
  0x2f   : > { %747 = vmatpush.msrb.mxu0 %v557_v22  ;;  %812 = vmatpush.msrb.mxu1 %v589_v23  ;;  %v546_v3 = vld [vmem:[%s1917_s3 + $0x30] sm:$0xff]  ;;  %v309_v8 = vld [vmem:[%s1518_s9 + $0x60] sm:$0xff]  ;;  %v312_v19 = vld [vmem:[%s1518_s9 + $0x78] sm:$0xff] }
  0x30   : > { %1186 = vmatmul.msk.f32.gmra.mxu0 %vm324_vm1, %v299_v15  ;;  %1203 = vmatmul.msk.f32.gmra.mxu1 %vm324_vm1, %v299_v15  ;;  %v578_v7 = vld [vmem:[%s1917_s3 + $0x130] sm:$0xff]  ;;  %v576_v10 = vld [vmem:[%s1917_s3 + $0x120] sm:$0xff]  ;;  %v573_v15 = vld [vmem:[%s1917_s3 + $0x108] sm:$0xff] }
  0x31   : > { %748 = vmatpush.msrb.mxu0 %v555_v25  ;;  %813 = vmatpush.msrb.mxu1 %v587_v26  ;;  %v542_v9 = vld [vmem:[%s1917_s3 + $0x10] sm:$0xff]  ;;  %v540_v11 = vld [vmem:[%s1917_s3] sm:$0xff]  ;;  %v914_v40 = vld [vmem:[#allocation2 + $0x60] sm:$0xff] }
  0x32   : > { %618 = vmatpush.msra.mxu2 %v554_v56  ;;  %682 = vmatpush.msra.mxu3 %v588_v57  ;;  %v574_v12 = vld [vmem:[%s1917_s3 + $0x110] sm:$0xff]  ;;  %v572_v14 = vld [vmem:[%s1917_s3 + $0x100] sm:$0xff]  ;;  %v930_v45 = vld [vmem:[#allocation2 + $0xe0] sm:$0xff] }
  0x33   : > { %749 = vmatpush.msrb.mxu0 %v553_v28  ;;  %814 = vmatpush.msrb.mxu1 %v585_v29  ;;  %v311_v17 = vld [vmem:[%s1518_s9 + $0x70] sm:$0xff]  ;;  %v933_v20 = vld [vmem:[#allocation2 + $0xf8] sm:$0xff]  ;;  %v932_v29 = vld [vmem:[#allocation2 + $0xf0] sm:$0xff]  ;;  %s1356_s9 = scalar_lea.hbm %s1355_s28, 128 }
  0x34   : > { %619 = vmatpush.msra.mxu2 %v552_v59  ;;  %683 = vmatpush.msra.mxu3 %v586_v60  ;;  %v931_v37 = vld [vmem:[#allocation2 + $0xe8] sm:$0xff]  ;;  %v913_v48 = vld [vmem:[#allocation2 + $0x58] sm:$0xff]  ;;  %v912_v56 = vld [vmem:[#allocation2 + $0x50] sm:$0xff]  ;;  %p1357_p0 = scmp.ne.s32.totalorder %s1355_s28, %s1356_s9  ;;  %p1362_p4 = scmp.lt.s32.totalorder %s1360_s16, %s1356_s9 }
  0x35   : > { %750 = vmatpush.msrb.mxu0 %v551_v31  ;;  %815 = vmatpush.msrb.mxu1 %v583_v32  ;;  %v915_v32 = vld [vmem:[#allocation2 + $0x68] sm:$0xff]  ;;  %v929_v53 = vld [vmem:[#allocation2 + $0xd8] sm:$0xff] }
  0x36   : > { %620 = vmatpush.msra.mxu2 %v550_v61  ;;  %684 = vmatpush.msra.mxu3 %v584_v62  ;;  %v928_v61 = vld [vmem:[#allocation2 + $0xd0] sm:$0xff]  ;;  %p1358_p1 = pnand %p1357_p0, %p1491_p5  ;;  %p1363_p7 = por %p1362_p4, %p1361_p3 }
  0x37   : > { %751 = vmatpush.msrb.mxu0 %v549_v34  ;;  %816 = vmatpush.msrb.mxu1 %v581_v36 }
  0x38   : > { %1187 = vmatmul.msk.f32.gmra.mxu0 %vm324_vm1, %v300_v18  ;;  %1204 = vmatmul.msk.f32.gmra.mxu1 %vm324_vm1, %v300_v18  ;;  %v917_v18 = vld [vmem:[#allocation2 + $0x78] sm:$0xff]  ;;  %p1359_p2 = pneg %p1358_p1 }
  0x39   : > { %752 = vmatpush.msrb.mxu0 %v547_v44  ;;  %817 = vmatpush.msrb.mxu1 %v579_v47 }
  0x3a   : > { %621 = vmatpush.msra.mxu2 %v548_v0  ;;  %685 = vmatpush.msra.mxu3 %v582_v1  ;;  %v911_v0 = vld [vmem:[#allocation2 + $0x48] sm:$0xff]  ;;  %p1364_p8 = pnand %p1363_p7, %p1359_p2 }
  0x3b   : > { %753 = vmatpush.msrb.mxu0 %v545_v55  ;;  %818 = vmatpush.msrb.mxu1 %v577_v58 }
  0x3c   : > { %622 = vmatpush.msra.mxu2 %v546_v3  ;;  %686 = vmatpush.msra.mxu3 %v580_v4 }
  0x3d   : > { %754 = vmatpush.msrb.mxu0 %v543_v2  ;;  %819 = vmatpush.msrb.mxu1 %v575_v5 }
  0x3e   : > { %623 = vmatpush.msra.mxu2 %v544_v6  ;;  %687 = vmatpush.msra.mxu3 %v578_v7  ;;  %v927_v7 = vld [vmem:[#allocation2 + $0xc8] sm:$0xff] }
  0x3f   : > { %755 = vmatpush.msrb.mxu0 %v541_v13  ;;  %820 = vmatpush.msrb.mxu1 %v573_v15  ;;  %v926_v15 = vld [vmem:[#allocation2 + $0xc0] sm:$0xff] }
  0x40   : > { %1188 = vmatmul.msk.f32.gmra.mxu0 %vm324_vm1, %v301_v21  ;;  %1205 = vmatmul.msk.f32.gmra.mxu1 %vm324_vm1, %v301_v21  ;;  %v314_v21 = vld [vmem:[%s1916_s2] sm:$0x3] }
  0x41   : > { %624 = vmatpush.msra.mxu2 %v542_v9  ;;  %688 = vmatpush.msra.mxu3 %v576_v10  ;;  %v1763_v22 = vperm.slane %v314_v21, 0  ;;  %v1765_v23 = vperm.slane %v314_v21, 1 }
  0x42   : > { %938 = vmatpush.msra.mxu0 %v917_v18  ;;  %1003 = vmatpush.msra.mxu1 %v933_v20 }
  0x43   : > { %625 = vmatpush.msra.mxu2 %v540_v11  ;;  %689 = vmatpush.msra.mxu3 %v574_v12 }
  0x44   : > { %1004 = vmatpush.msra.mxu1 %v932_v29 }
  0x45   : > { %690 = vmatpush.msra.mxu3 %v572_v14  ;;  %1223 = vmatpush.msrb.mxu2 %v917_v18 }
  0x46   : > { %1005 = vmatpush.msra.mxu1 %v931_v37 }
  0x47   : > { %1239 = vmatpush.msrb.mxu3 %v933_v20 }
  0x48   : > { %1189 = vmatmul.msk.f32.gmra.mxu0 %vm324_vm1, %v302_v24  ;;  %1206 = vmatmul.msk.f32.gmra.mxu1 %vm324_vm1, %v302_v24  ;;  %v916_v24 = vld [vmem:[#allocation2 + $0x70] sm:$0xff] }
  0x49   : > { %1224 = vmatpush.msrb.mxu2 %v916_v24  ;;  %939 = vmatpush.msra.mxu0 %v916_v24 }
  0x4a   : > { %1240 = vmatpush.msrb.mxu3 %v932_v29  ;;  %1006 = vmatpush.msra.mxu1 %v930_v45 }
  0x4b   : > { %1225 = vmatpush.msrb.mxu2 %v915_v32  ;;  %940 = vmatpush.msra.mxu0 %v915_v32 }
  0x4c   : > { %1241 = vmatpush.msrb.mxu3 %v931_v37  ;;  %1007 = vmatpush.msra.mxu1 %v929_v53 }
  0x4d   : > { %1226 = vmatpush.msrb.mxu2 %v914_v40  ;;  %941 = vmatpush.msra.mxu0 %v914_v40 }
  0x4e   : > { %1242 = vmatpush.msrb.mxu3 %v930_v45  ;;  %1008 = vmatpush.msra.mxu1 %v928_v61 }
  0x4f   : > { %1227 = vmatpush.msrb.mxu2 %v913_v48  ;;  %942 = vmatpush.msra.mxu0 %v913_v48 }
  0x50   : > { %1190 = vmatmul.msk.f32.gmra.mxu0 %vm324_vm1, %v303_v27  ;;  %1207 = vmatmul.msk.f32.gmra.mxu1 %vm324_vm1, %v303_v27 }
  0x51   : > { %1243 = vmatpush.msrb.mxu3 %v929_v53  ;;  %1228 = vmatpush.msrb.mxu2 %v912_v56 }
  0x52   : > { %943 = vmatpush.msra.mxu0 %v912_v56  ;;  %1009 = vmatpush.msra.mxu1 %v927_v7 }
  0x53   : > { %1244 = vmatpush.msrb.mxu3 %v928_v61  ;;  %1229 = vmatpush.msrb.mxu2 %v911_v0 }
  0x54   : > { %944 = vmatpush.msra.mxu0 %v911_v0  ;;  %1010 = vmatpush.msra.mxu1 %v926_v15 }
  0x55   : > { %1245 = vmatpush.msrb.mxu3 %v927_v7 }
  0x57   : > { %1246 = vmatpush.msrb.mxu3 %v926_v15 }
  0x58   : > { %1191 = vmatmul.msk.f32.gmra.mxu0 %vm324_vm1, %v304_v30  ;;  %1208 = vmatmul.msk.f32.gmra.mxu1 %vm324_vm1, %v304_v30 }
  0x60   : > { %1192 = vmatmul.msk.f32.gmra.mxu0 %vm324_vm1, %v305_v33  ;;  %1209 = vmatmul.msk.f32.gmra.mxu1 %vm324_vm1, %v305_v33 }
  0x68   : > { %1193 = vmatmul.msk.f32.gmra.mxu0 %vm324_vm1, %v306_v41  ;;  %1210 = vmatmul.msk.f32.gmra.mxu1 %vm324_vm1, %v306_v41 }
  0x70   : > { %1194 = vmatmul.msk.f32.gmra.mxu0 %vm324_vm1, %v307_v52  ;;  %1211 = vmatmul.msk.f32.gmra.mxu1 %vm324_vm1, %v307_v52 }
  0x78   : > { %1195 = vmatmul.msk.f32.gmra.mxu0 %vm324_vm1, %v308_v63  ;;  %1212 = vmatmul.msk.f32.gmra.mxu1 %vm324_vm1, %v308_v63 }
  0x80   : > { %1196 = vmatmul.msk.f32.gmra.mxu0 %vm324_vm1, %v309_v8  ;;  %1213 = vmatmul.msk.f32.gmra.mxu1 %vm324_vm1, %v309_v8  ;;  %v910_v8 = vld [vmem:[#allocation2 + $0x40] sm:$0xff] }
  0x81   : > { %1230 = vmatpush.msrb.mxu2 %v910_v8  ;;  %945 = vmatpush.msra.mxu0 %v910_v8 }
  0x88   : > { %1197 = vmatmul.msk.f32.gmra.mxu0 %vm324_vm1, %v310_v16  ;;  %1214 = vmatmul.msk.f32.gmra.mxu1 %vm324_vm1, %v310_v16  ;;  %v909_v16 = vld [vmem:[#allocation2 + $0x38] sm:$0xff] }
  0x89   : > { %1231 = vmatpush.msrb.mxu2 %v909_v16  ;;  %946 = vmatpush.msra.mxu0 %v909_v16 }
  0x90   : > { %1198 = vmatmul.msk.f32.gmra.mxu0 %vm324_vm1, %v311_v17  ;;  %1215 = vmatmul.msk.f32.gmra.mxu1 %vm324_vm1, %v311_v17 }
  0x98   : > { %1199 = vmatmul.msk.f32.gmra.mxu0 %vm324_vm1, %v312_v19  ;;  %1216 = vmatmul.msk.f32.gmra.mxu1 %vm324_vm1, %v312_v19 }
  0x9d   : > { %v395_v25 = vpop.f32.mrf.mxu0  ;;  %v460_v26 = vpop.f32.mrf.mxu1 }
  0x9e   : > { %v396_v27 = vadd.f32 %v395_v25, %v1763_v22  ;;  %v461_v28 = vadd.f32 %v460_v26, %v1765_v23  ;;  %v925_v25 = vld [vmem:[#allocation2 + $0xb8] sm:$0xff]  ;;  %v908_v26 = vld [vmem:[#allocation2 + $0x30] sm:$0xff] }
  0x9f   : > { %1247 = vmatpush.msrb.mxu3 %v925_v25  ;;  %1011 = vmatpush.msra.mxu1 %v925_v25 }
  0xa0   : > { %v508_v30 = vmax.f32 %v396_v27, 0.0  ;;  %v509_v31 = vmax.f32 %v461_v28, 0.0  ;;  %1232 = vmatpush.msrb.mxu2 %v908_v26  ;;  %947 = vmatpush.msra.mxu0 %v908_v26  ;;  %v604_v26 = vld [vmem:[%s1918_s4] sm:$0x3] }
  0xa2   : > { %626 = vmatmul.f32.vlgmr.msra.gmra.mxu2 %v508_v30  ;;  %756 = vmatmul.f32.vlgmr.msrb.gmra.mxu0 %v508_v30 }
  0xa3   : > { %691 = vmatmul.f32.vlgmr.msra.gmra.mxu3 %v509_v31  ;;  %821 = vmatmul.f32.vlgmr.msrb.gmra.mxu1 %v509_v31 }
  0xa5   : > { %v398_v33 = vpop.f32.mrf.mxu0  ;;  %v463_v34 = vpop.f32.mrf.mxu1 }
  0xa6   : > { %v399_v35 = vadd.f32 %v398_v33, %v1763_v22  ;;  %v464_v36 = vadd.f32 %v463_v34, %v1765_v23  ;;  %v924_v33 = vld [vmem:[#allocation2 + $0xb0] sm:$0xff]  ;;  %v907_v34 = vld [vmem:[#allocation2 + $0x28] sm:$0xff] }
  0xa7   : > { %1248 = vmatpush.msrb.mxu3 %v924_v33  ;;  %1012 = vmatpush.msra.mxu1 %v924_v33 }
  0xa8   : > { %v510_v38 = vmax.f32 %v399_v35, 0.0  ;;  %v511_v39 = vmax.f32 %v464_v36, 0.0  ;;  %1233 = vmatpush.msrb.mxu2 %v907_v34  ;;  %948 = vmatpush.msra.mxu0 %v907_v34 }
  0xaa   : > { %629 = vmatmul.f32.gmra.mxu2 %v510_v38  ;;  %759 = vmatmul.f32.gmra.mxu0 %v510_v38 }
  0xab   : > { %694 = vmatmul.f32.gmra.mxu3 %v511_v39  ;;  %824 = vmatmul.f32.gmra.mxu1 %v511_v39 }
  0xad   : > { %v401_v41 = vpop.f32.mrf.mxu0  ;;  %v466_v42 = vpop.f32.mrf.mxu1 }
  0xae   : > { %v402_v43 = vadd.f32 %v401_v41, %v1763_v22  ;;  %v467_v44 = vadd.f32 %v466_v42, %v1765_v23  ;;  %v923_v41 = vld [vmem:[#allocation2 + $0xa8] sm:$0xff]  ;;  %v906_v42 = vld [vmem:[#allocation2 + $0x20] sm:$0xff] }
  0xaf   : > { %1249 = vmatpush.msrb.mxu3 %v923_v41  ;;  %1013 = vmatpush.msra.mxu1 %v923_v41 }
  0xb0   : > { %v512_v46 = vmax.f32 %v402_v43, 0.0  ;;  %v513_v47 = vmax.f32 %v467_v44, 0.0  ;;  %1234 = vmatpush.msrb.mxu2 %v906_v42  ;;  %949 = vmatpush.msra.mxu0 %v906_v42 }
  0xb2   : > { %632 = vmatmul.f32.gmra.mxu2 %v512_v46  ;;  %762 = vmatmul.f32.gmra.mxu0 %v512_v46 }
  0xb3   : > { %697 = vmatmul.f32.gmra.mxu3 %v513_v47  ;;  %827 = vmatmul.f32.gmra.mxu1 %v513_v47 }
  0xb5   : > { %v404_v49 = vpop.f32.mrf.mxu0  ;;  %v469_v50 = vpop.f32.mrf.mxu1 }
  0xb6   : > { %v405_v51 = vadd.f32 %v404_v49, %v1763_v22  ;;  %v470_v52 = vadd.f32 %v469_v50, %v1765_v23  ;;  %v922_v49 = vld [vmem:[#allocation2 + $0xa0] sm:$0xff]  ;;  %v905_v50 = vld [vmem:[#allocation2 + $0x18] sm:$0xff] }
  0xb7   : > { %1250 = vmatpush.msrb.mxu3 %v922_v49  ;;  %1014 = vmatpush.msra.mxu1 %v922_v49 }
  0xb8   : > { %v514_v54 = vmax.f32 %v405_v51, 0.0  ;;  %v515_v55 = vmax.f32 %v470_v52, 0.0  ;;  %1235 = vmatpush.msrb.mxu2 %v905_v50  ;;  %950 = vmatpush.msra.mxu0 %v905_v50 }
  0xba   : > { %635 = vmatmul.f32.gmra.mxu2 %v514_v54  ;;  %765 = vmatmul.f32.gmra.mxu0 %v514_v54 }
  0xbb   : > { %700 = vmatmul.f32.gmra.mxu3 %v515_v55  ;;  %830 = vmatmul.f32.gmra.mxu1 %v515_v55 }
  0xbd   : > { %v407_v57 = vpop.f32.mrf.mxu0  ;;  %v472_v58 = vpop.f32.mrf.mxu1 }
  0xbe   : > { %v408_v59 = vadd.f32 %v407_v57, %v1763_v22  ;;  %v473_v60 = vadd.f32 %v472_v58, %v1765_v23  ;;  %v921_v57 = vld [vmem:[#allocation2 + $0x98] sm:$0xff]  ;;  %v904_v58 = vld [vmem:[#allocation2 + $0x10] sm:$0xff] }
  0xbf   : > { %1251 = vmatpush.msrb.mxu3 %v921_v57  ;;  %1015 = vmatpush.msra.mxu1 %v921_v57 }
  0xc0   : > { %v516_v62 = vmax.f32 %v408_v59, 0.0  ;;  %v517_v63 = vmax.f32 %v473_v60, 0.0  ;;  %v920_v59 = vld [vmem:[#allocation2 + $0x90] sm:$0xff]  ;;  %1236 = vmatpush.msrb.mxu2 %v904_v58  ;;  %951 = vmatpush.msra.mxu0 %v904_v58 }
  0xc1   : > { %1252 = vmatpush.msrb.mxu3 %v920_v59  ;;  %1016 = vmatpush.msra.mxu1 %v920_v59 }
  0xc2   : > { %638 = vmatmul.f32.gmra.mxu2 %v516_v62  ;;  %768 = vmatmul.f32.gmra.mxu0 %v516_v62 }
  0xc3   : > { %703 = vmatmul.f32.gmra.mxu3 %v517_v63  ;;  %833 = vmatmul.f32.gmra.mxu1 %v517_v63 }
  0xc5   : > { %v410_v1 = vpop.f32.mrf.mxu0  ;;  %v475_v2 = vpop.f32.mrf.mxu1 }
  0xc6   : > { %v411_v3 = vadd.f32 %v410_v1, %v1763_v22  ;;  %v476_v4 = vadd.f32 %v475_v2, %v1765_v23  ;;  %v919_v2 = vld [vmem:[#allocation2 + $0x88] sm:$0xff] }
  0xc7   : > { %1017 = vmatpush.msra.mxu1 %v919_v2  ;;  %1253 = vmatpush.msrb.mxu3 %v919_v2 }
  0xc8   : > { %v518_v5 = vmax.f32 %v411_v3, 0.0  ;;  %v519_v6 = vmax.f32 %v476_v4, 0.0  ;;  %v903_v3 = vld [vmem:[#allocation2 + $0x8] sm:$0xff]  ;;  %v918_v4 = vld [vmem:[#allocation2 + $0x80] sm:$0xff] }
  0xc9   : > { %1237 = vmatpush.msrb.mxu2 %v903_v3  ;;  %952 = vmatpush.msra.mxu0 %v903_v3 }
  0xca   : > { %641 = vmatmul.f32.gmra.mxu2 %v518_v5  ;;  %771 = vmatmul.f32.gmra.mxu0 %v518_v5 }
  0xcb   : > { %706 = vmatmul.f32.gmra.mxu3 %v519_v6  ;;  %836 = vmatmul.f32.gmra.mxu1 %v519_v6 }
  0xcc   : > { %1018 = vmatpush.msra.mxu1 %v918_v4  ;;  %1254 = vmatpush.msrb.mxu3 %v918_v4 }
  0xcd   : > { %v413_v9 = vpop.f32.mrf.mxu0  ;;  %v478_v10 = vpop.f32.mrf.mxu1 }
  0xce   : > { %v414_v11 = vadd.f32 %v413_v9, %v1763_v22  ;;  %v479_v12 = vadd.f32 %v478_v10, %v1765_v23 }
  0xd0   : > { %v520_v13 = vmax.f32 %v414_v11, 0.0  ;;  %v521_v14 = vmax.f32 %v479_v12, 0.0  ;;  %v902_v11 = vld [vmem:[#allocation2] sm:$0xff] }
  0xd1   : > { %953 = vmatpush.msra.mxu0 %v902_v11  ;;  %1238 = vmatpush.msrb.mxu2 %v902_v11 }
  0xd2   : > { %644 = vmatmul.f32.gmra.mxu2 %v520_v13  ;;  %774 = vmatmul.f32.gmra.mxu0 %v520_v13 }
  0xd3   : > { %709 = vmatmul.f32.gmra.mxu3 %v521_v14  ;;  %839 = vmatmul.f32.gmra.mxu1 %v521_v14 }
  0xd5   : > { %v416_v17 = vpop.f32.mrf.mxu0  ;;  %v481_v18 = vpop.f32.mrf.mxu1 }
  0xd6   : > { %v417_v19 = vadd.f32 %v416_v17, %v1763_v22  ;;  %v482_v20 = vadd.f32 %v481_v18, %v1765_v23 }
  0xd8   : > { %v522_v21 = vmax.f32 %v417_v19, 0.0  ;;  %v523_v24 = vmax.f32 %v482_v20, 0.0 }
  0xda   : > { %647 = vmatmul.f32.gmra.mxu2 %v522_v21  ;;  %777 = vmatmul.f32.gmra.mxu0 %v522_v21 }
  0xdb   : > { %712 = vmatmul.f32.gmra.mxu3 %v523_v24  ;;  %842 = vmatmul.f32.gmra.mxu1 %v523_v24 }
  0xdd   : > { %v419_v27 = vpop.f32.mrf.mxu0  ;;  %v484_v28 = vpop.f32.mrf.mxu1 }
  0xde   : > { %v420_v29 = vadd.f32 %v419_v27, %v1763_v22  ;;  %v485_v30 = vadd.f32 %v484_v28, %v1765_v23  ;;  %v1802_v27 = vperm.slane %v604_v26, 1 }
  0xe0   : > { %v524_v31 = vmax.f32 %v420_v29, 0.0  ;;  %v525_v32 = vmax.f32 %v485_v30, 0.0 }
  0xe2   : > { %650 = vmatmul.f32.gmra.mxu2 %v524_v31  ;;  %780 = vmatmul.f32.gmra.mxu0 %v524_v31 }
  0xe3   : > { %715 = vmatmul.f32.gmra.mxu3 %v525_v32  ;;  %845 = vmatmul.f32.gmra.mxu1 %v525_v32 }
  0xe5   : > { %v422_v35 = vpop.f32.mrf.mxu0  ;;  %v487_v36 = vpop.f32.mrf.mxu1 }
  0xe6   : > { %v423_v37 = vadd.f32 %v422_v35, %v1763_v22  ;;  %v488_v38 = vadd.f32 %v487_v36, %v1765_v23 }
  0xe8   : > { %v526_v39 = vmax.f32 %v423_v37, 0.0  ;;  %v527_v40 = vmax.f32 %v488_v38, 0.0 }
  0xea   : > { %653 = vmatmul.f32.gmra.mxu2 %v526_v39  ;;  %783 = vmatmul.f32.gmra.mxu0 %v526_v39 }
  0xeb   : > { %718 = vmatmul.f32.gmra.mxu3 %v527_v40  ;;  %848 = vmatmul.f32.gmra.mxu1 %v527_v40 }
  0xed   : > { %v425_v43 = vpop.f32.mrf.mxu0  ;;  %v490_v44 = vpop.f32.mrf.mxu1 }
  0xee   : > { %v426_v45 = vadd.f32 %v425_v43, %v1763_v22  ;;  %v491_v46 = vadd.f32 %v490_v44, %v1765_v23 }
  0xf0   : > { %v528_v47 = vmax.f32 %v426_v45, 0.0  ;;  %v529_v48 = vmax.f32 %v491_v46, 0.0 }
  0xf2   : > { %656 = vmatmul.f32.gmra.mxu2 %v528_v47  ;;  %786 = vmatmul.f32.gmra.mxu0 %v528_v47 }
  0xf3   : > { %721 = vmatmul.f32.gmra.mxu3 %v529_v48  ;;  %851 = vmatmul.f32.gmra.mxu1 %v529_v48 }
  0xf5   : > { %v428_v51 = vpop.f32.mrf.mxu0  ;;  %v493_v52 = vpop.f32.mrf.mxu1 }
  0xf6   : > { %v429_v53 = vadd.f32 %v428_v51, %v1763_v22  ;;  %v494_v54 = vadd.f32 %v493_v52, %v1765_v23 }
  0xf8   : > { %v530_v55 = vmax.f32 %v429_v53, 0.0  ;;  %v531_v56 = vmax.f32 %v494_v54, 0.0 }
  0xfa   : > { %659 = vmatmul.f32.gmra.mxu2 %v530_v55  ;;  %789 = vmatmul.f32.gmra.mxu0 %v530_v55 }
  0xfb   : > { %724 = vmatmul.f32.gmra.mxu3 %v531_v56  ;;  %854 = vmatmul.f32.gmra.mxu1 %v531_v56 }
  0xfd   : > { %v431_v60 = vpop.f32.mrf.mxu0  ;;  %v496_v61 = vpop.f32.mrf.mxu1 }
  0xfe   : > { %v432_v62 = vadd.f32 %v431_v60, %v1763_v22  ;;  %v497_v63 = vadd.f32 %v496_v61, %v1765_v23 }
 0x100   : > { %v532_v0 = vmax.f32 %v432_v62, 0.0  ;;  %v533_v1 = vmax.f32 %v497_v63, 0.0 }
 0x102   : > { %662 = vmatmul.f32.gmra.mxu2 %v532_v0  ;;  %792 = vmatmul.f32.gmra.mxu0 %v532_v0 }
 0x103   : > { %727 = vmatmul.f32.gmra.mxu3 %v533_v1  ;;  %857 = vmatmul.f32.gmra.mxu1 %v533_v1 }
 0x105   : > { %v434_v5 = vpop.f32.mrf.mxu0  ;;  %v499_v6 = vpop.f32.mrf.mxu1 }
 0x106   : > { %v435_v7 = vadd.f32 %v434_v5, %v1763_v22  ;;  %v500_v8 = vadd.f32 %v499_v6, %v1765_v23 }
 0x108   : > { %v534_v9 = vmax.f32 %v435_v7, 0.0  ;;  %v535_v10 = vmax.f32 %v500_v8, 0.0 }
 0x10a   : > { %665 = vmatmul.f32.gmra.mxu2 %v534_v9  ;;  %795 = vmatmul.f32.gmra.mxu0 %v534_v9 }
 0x10b   : > { %730 = vmatmul.f32.gmra.mxu3 %v535_v10  ;;  %860 = vmatmul.f32.gmra.mxu1 %v535_v10 }
 0x10d   : > { %v437_v12 = vpop.f32.mrf.mxu0  ;;  %v502_v13 = vpop.f32.mrf.mxu1 }
 0x10e   : > { %v438_v14 = vadd.f32 %v437_v12, %v1763_v22  ;;  %v503_v15 = vadd.f32 %v502_v13, %v1765_v23 }
 0x110   : > { %v536_v16 = vmax.f32 %v438_v14, 0.0  ;;  %v537_v17 = vmax.f32 %v503_v15, 0.0 }
 0x112   : > { %668 = vmatmul.f32.gmra.mxu2 %v536_v16  ;;  %798 = vmatmul.f32.gmra.mxu0 %v536_v16 }
 0x113   : > { %733 = vmatmul.f32.gmra.mxu3 %v537_v17  ;;  %863 = vmatmul.f32.gmra.mxu1 %v537_v17 }
 0x115   : > { %v440_v18 = vpop.f32.mrf.mxu0  ;;  %v505_v19 = vpop.f32.mrf.mxu1 }
 0x116   : > { %v441_v20 = vadd.f32 %v440_v18, %v1763_v22  ;;  %v506_v21 = vadd.f32 %v505_v19, %v1765_v23  ;;  %v1805_v22 = vperm.slane %v604_v26, 0 }
 0x118   : > { %v538_v24 = vmax.f32 %v441_v20, 0.0  ;;  %v539_v25 = vmax.f32 %v506_v21, 0.0 }
 0x11a   : > { %671 = vmatmul.f32.gmra.mxu2 %v538_v24  ;;  %801 = vmatmul.f32.gmra.mxu0 %v538_v24 }
 0x11b   : > { %736 = vmatmul.f32.gmra.mxu3 %v539_v25  ;;  %866 = vmatmul.f32.gmra.mxu1 %v539_v25 }
 0x11f   : > { %v757_v28 = vpop.f32.mrf.mxu0 }
 0x120   : > { %v758_v29 = vadd.f32 %v757_v28, %v1802_v27  ;;  %v822_v30 = vpop.f32.mrf.mxu1 }
 0x122   : > { %v823_v31 = vadd.f32 %v822_v30, %v758_v29 }
 0x124   : > { %v871_v23 = vmax.f32 %v823_v31, 0.0 }
 0x125   : > { %v627_v32 = vpop.f32.mrf.mxu2 }
 0x126   : > { %v628_v33 = vadd.f32 %v627_v32, %v1805_v22  ;;  %1019 = vmatmul.f32.vlgmr.msra.gmra.mxu1 %v871_v23  ;;  %v692_v34 = vpop.f32.mrf.mxu3 }
 0x127   : > { %v760_v35 = vpop.f32.mrf.mxu0 }
 0x128   : > { %v693_v36 = vadd.f32 %v692_v34, %v628_v33  ;;  %v761_v37 = vadd.f32 %v760_v35, %v1802_v27  ;;  %v825_v38 = vpop.f32.mrf.mxu1 }
 0x12a   : > { %v870_v39 = vmax.f32 %v693_v36, 0.0  ;;  %v826_v40 = vadd.f32 %v825_v38, %v761_v37 }
 0x12c   : > { %v873_v41 = vmax.f32 %v826_v40, 0.0  ;;  %954 = vmatmul.f32.vlgmr.msra.gmra.mxu0 %v870_v39 }
 0x12d   : > { %v630_v42 = vpop.f32.mrf.mxu2 }
 0x12e   : > { %v631_v43 = vadd.f32 %v630_v42, %v1805_v22  ;;  %1022 = vmatmul.f32.vlgmr.msrb.gmra.mxu3 %v873_v41  ;;  %v695_v44 = vpop.f32.mrf.mxu3 }
 0x12f   : > { %v763_v45 = vpop.f32.mrf.mxu0 }
 0x130   : > { %v696_v46 = vadd.f32 %v695_v44, %v631_v43  ;;  %v764_v47 = vadd.f32 %v763_v45, %v1802_v27  ;;  %v828_v48 = vpop.f32.mrf.mxu1 }
 0x132   : > { %v872_v49 = vmax.f32 %v696_v46, 0.0  ;;  %v829_v50 = vadd.f32 %v828_v48, %v764_v47 }
 0x134   : > { %v875_v51 = vmax.f32 %v829_v50, 0.0  ;;  %957 = vmatmul.f32.vlgmr.msrb.gmra.mxu2 %v872_v49 }
 0x135   : > { %v633_v52 = vpop.f32.mrf.mxu2 }
 0x136   : > { %v634_v53 = vadd.f32 %v633_v52, %v1805_v22  ;;  %1025 = vmatmul.f32.gmra.mxu3 %v875_v51  ;;  %v698_v54 = vpop.f32.mrf.mxu3 }
 0x137   : > { %v766_v55 = vpop.f32.mrf.mxu0 }
 0x138   : > { %v699_v56 = vadd.f32 %v698_v54, %v634_v53  ;;  %v767_v57 = vadd.f32 %v766_v55, %v1802_v27  ;;  %v831_v58 = vpop.f32.mrf.mxu1 }
 0x13a   : > { %v832_v59 = vadd.f32 %v831_v58, %v767_v57  ;;  %v874_v60 = vmax.f32 %v699_v56, 0.0 }
 0x13c   : > { %v877_v61 = vmax.f32 %v832_v59, 0.0  ;;  %960 = vmatmul.f32.gmra.mxu2 %v874_v60 }
 0x13d   : > { %v636_v62 = vpop.f32.mrf.mxu2 }
 0x13e   : > { %v637_v63 = vadd.f32 %v636_v62, %v1805_v22  ;;  %1028 = vmatmul.f32.gmra.mxu3 %v877_v61  ;;  %v701_v0 = vpop.f32.mrf.mxu3 }
 0x13f   : > { %v769_v1 = vpop.f32.mrf.mxu0 }
 0x140   : > { %v702_v2 = vadd.f32 %v701_v0, %v637_v63  ;;  %v770_v3 = vadd.f32 %v769_v1, %v1802_v27  ;;  %v834_v4 = vpop.f32.mrf.mxu1 }
 0x142   : > { %v835_v5 = vadd.f32 %v834_v4, %v770_v3  ;;  %v876_v6 = vmax.f32 %v702_v2, 0.0 }
 0x144   : > { %v879_v7 = vmax.f32 %v835_v5, 0.0  ;;  %963 = vmatmul.f32.gmra.mxu2 %v876_v6 }
 0x145   : > { %v639_v8 = vpop.f32.mrf.mxu2 }
 0x146   : > { %v640_v9 = vadd.f32 %v639_v8, %v1805_v22  ;;  %1031 = vmatmul.f32.gmra.mxu3 %v879_v7  ;;  %v704_v10 = vpop.f32.mrf.mxu3 }
 0x147   : > { %v772_v11 = vpop.f32.mrf.mxu0 }
 0x148   : > { %v705_v12 = vadd.f32 %v704_v10, %v640_v9  ;;  %v773_v13 = vadd.f32 %v772_v11, %v1802_v27  ;;  %v837_v14 = vpop.f32.mrf.mxu1 }
 0x14a   : > { %v838_v15 = vadd.f32 %v837_v14, %v773_v13  ;;  %v878_v16 = vmax.f32 %v705_v12, 0.0 }
 0x14c   : > { %v881_v17 = vmax.f32 %v838_v15, 0.0  ;;  %966 = vmatmul.f32.gmra.mxu2 %v878_v16 }
 0x14d   : > { %v642_v18 = vpop.f32.mrf.mxu2 }
 0x14e   : > { %v643_v19 = vadd.f32 %v642_v18, %v1805_v22  ;;  %1034 = vmatmul.f32.gmra.mxu3 %v881_v17  ;;  %v707_v20 = vpop.f32.mrf.mxu3 }
 0x14f   : > { %v775_v21 = vpop.f32.mrf.mxu0 }
 0x150   : > { %v708_v24 = vadd.f32 %v707_v20, %v643_v19  ;;  %v776_v25 = vadd.f32 %v775_v21, %v1802_v27  ;;  %v840_v26 = vpop.f32.mrf.mxu1 }
 0x152   : > { %v841_v28 = vadd.f32 %v840_v26, %v776_v25  ;;  %v880_v29 = vmax.f32 %v708_v24, 0.0 }
 0x154   : > { %v883_v30 = vmax.f32 %v841_v28, 0.0  ;;  %969 = vmatmul.f32.gmra.mxu2 %v880_v29 }
 0x155   : > { %v645_v31 = vpop.f32.mrf.mxu2 }
 0x156   : > { %v646_v23 = vadd.f32 %v645_v31, %v1805_v22  ;;  %1037 = vmatmul.f32.gmra.mxu3 %v883_v30  ;;  %v710_v32 = vpop.f32.mrf.mxu3 }
 0x157   : > { %v778_v33 = vpop.f32.mrf.mxu0 }
 0x158   : > { %v711_v34 = vadd.f32 %v710_v32, %v646_v23  ;;  %v779_v35 = vadd.f32 %v778_v33, %v1802_v27  ;;  %v843_v36 = vpop.f32.mrf.mxu1 }
 0x15a   : > { %v844_v37 = vadd.f32 %v843_v36, %v779_v35  ;;  %v882_v38 = vmax.f32 %v711_v34, 0.0 }
 0x15c   : > { %v885_v39 = vmax.f32 %v844_v37, 0.0  ;;  %972 = vmatmul.f32.gmra.mxu2 %v882_v38 }
 0x15d   : > { %v648_v40 = vpop.f32.mrf.mxu2 }
 0x15e   : > { %v649_v41 = vadd.f32 %v648_v40, %v1805_v22  ;;  %1040 = vmatmul.f32.gmra.mxu3 %v885_v39  ;;  %v713_v42 = vpop.f32.mrf.mxu3 }
 0x15f   : > { %v781_v43 = vpop.f32.mrf.mxu0 }
 0x160   : > { %v714_v44 = vadd.f32 %v713_v42, %v649_v41  ;;  %v782_v45 = vadd.f32 %v781_v43, %v1802_v27  ;;  %v846_v46 = vpop.f32.mrf.mxu1 }
 0x162   : > { %v884_v47 = vmax.f32 %v714_v44, 0.0  ;;  %v847_v48 = vadd.f32 %v846_v46, %v782_v45 }
 0x164   : > { %v887_v49 = vmax.f32 %v847_v48, 0.0  ;;  %975 = vmatmul.f32.gmra.mxu2 %v884_v47 }
 0x165   : > { %v651_v50 = vpop.f32.mrf.mxu2 }
 0x166   : > { %v652_v51 = vadd.f32 %v651_v50, %v1805_v22  ;;  %1043 = vmatmul.f32.gmra.mxu3 %v887_v49  ;;  %v716_v52 = vpop.f32.mrf.mxu3 }
 0x167   : > { %v784_v53 = vpop.f32.mrf.mxu0 }
 0x168   : > { %v717_v54 = vadd.f32 %v716_v52, %v652_v51  ;;  %v785_v55 = vadd.f32 %v784_v53, %v1802_v27  ;;  %v849_v56 = vpop.f32.mrf.mxu1 }
 0x16a   : > { %v886_v57 = vmax.f32 %v717_v54, 0.0  ;;  %v850_v58 = vadd.f32 %v849_v56, %v785_v55 }
 0x16c   : > { %v889_v59 = vmax.f32 %v850_v58, 0.0  ;;  %978 = vmatmul.f32.gmra.mxu2 %v886_v57 }
 0x16d   : > { %v654_v60 = vpop.f32.mrf.mxu2 }
 0x16e   : > { %v655_v61 = vadd.f32 %v654_v60, %v1805_v22  ;;  %1046 = vmatmul.f32.gmra.mxu3 %v889_v59  ;;  %v719_v62 = vpop.f32.mrf.mxu3 }
 0x16f   : > { %v787_v63 = vpop.f32.mrf.mxu0 }
 0x170   : > { %v720_v0 = vadd.f32 %v719_v62, %v655_v61  ;;  %v788_v1 = vadd.f32 %v787_v63, %v1802_v27  ;;  %v852_v2 = vpop.f32.mrf.mxu1  ;;  %v1842_v63 = vld [vmem:[%s1920_s6] ss:$0 sm:$0xff] }
 0x172   : > { %v888_v3 = vmax.f32 %v720_v0, 0.0  ;;  %v853_v4 = vadd.f32 %v852_v2, %v788_v1 }
 0x174   : > { %v891_v5 = vmax.f32 %v853_v4, 0.0  ;;  %981 = vmatmul.f32.gmra.mxu2 %v888_v3 }
 0x175   : > { %v657_v6 = vpop.f32.mrf.mxu2 }
 0x176   : > { %v658_v7 = vadd.f32 %v657_v6, %v1805_v22  ;;  %1049 = vmatmul.f32.gmra.mxu3 %v891_v5  ;;  %v722_v8 = vpop.f32.mrf.mxu3 }
 0x177   : > { %v790_v9 = vpop.f32.mrf.mxu0 }
 0x178   : > { %v723_v10 = vadd.f32 %v722_v8, %v658_v7  ;;  %v791_v11 = vadd.f32 %v790_v9, %v1802_v27  ;;  %v855_v12 = vpop.f32.mrf.mxu1 }
 0x17a   : > { %v890_v13 = vmax.f32 %v723_v10, 0.0  ;;  %v856_v14 = vadd.f32 %v855_v12, %v791_v11 }
 0x17c   : > { %v893_v15 = vmax.f32 %v856_v14, 0.0  ;;  %984 = vmatmul.f32.gmra.mxu2 %v890_v13 }
 0x17d   : > { %v660_v16 = vpop.f32.mrf.mxu2 }
 0x17e   : > { %v661_v17 = vadd.f32 %v660_v16, %v1805_v22  ;;  %1052 = vmatmul.f32.gmra.mxu3 %v893_v15  ;;  %v725_v18 = vpop.f32.mrf.mxu3 }
 0x17f   : > { %v793_v19 = vpop.f32.mrf.mxu0 }
 0x180   : > { %v726_v20 = vadd.f32 %v725_v18, %v661_v17  ;;  %v794_v21 = vadd.f32 %v793_v19, %v1802_v27  ;;  %v858_v24 = vpop.f32.mrf.mxu1 }
 0x182   : > { %v892_v25 = vmax.f32 %v726_v20, 0.0  ;;  %v859_v26 = vadd.f32 %v858_v24, %v794_v21 }
 0x184   : > { %v895_v28 = vmax.f32 %v859_v26, 0.0  ;;  %987 = vmatmul.f32.gmra.mxu2 %v892_v25 }
 0x185   : > { %v663_v29 = vpop.f32.mrf.mxu2 }
 0x186   : > { %v664_v30 = vadd.f32 %v663_v29, %v1805_v22  ;;  %1055 = vmatmul.f32.gmra.mxu3 %v895_v28  ;;  %v728_v31 = vpop.f32.mrf.mxu3 }
 0x187   : > { %v796_v23 = vpop.f32.mrf.mxu0 }
 0x188   : > { %v729_v32 = vadd.f32 %v728_v31, %v664_v30  ;;  %v797_v33 = vadd.f32 %v796_v23, %v1802_v27  ;;  %v861_v34 = vpop.f32.mrf.mxu1 }
 0x18a   : > { %v894_v35 = vmax.f32 %v729_v32, 0.0  ;;  %v862_v36 = vadd.f32 %v861_v34, %v797_v33 }
 0x18c   : > { %v897_v37 = vmax.f32 %v862_v36, 0.0  ;;  %990 = vmatmul.f32.gmra.mxu2 %v894_v35 }
 0x18d   : > { %v666_v38 = vpop.f32.mrf.mxu2 }
 0x18e   : > { %v667_v39 = vadd.f32 %v666_v38, %v1805_v22  ;;  %1058 = vmatmul.f32.gmra.mxu3 %v897_v37  ;;  %v731_v40 = vpop.f32.mrf.mxu3 }
 0x18f   : > { %v799_v41 = vpop.f32.mrf.mxu0 }
 0x190   : > { %v732_v42 = vadd.f32 %v731_v40, %v667_v39  ;;  %v800_v43 = vadd.f32 %v799_v41, %v1802_v27  ;;  %v864_v44 = vpop.f32.mrf.mxu1 }
 0x192   : > { %v896_v45 = vmax.f32 %v732_v42, 0.0  ;;  %v865_v46 = vadd.f32 %v864_v44, %v800_v43 }
 0x194   : > { %v899_v47 = vmax.f32 %v865_v46, 0.0  ;;  %993 = vmatmul.f32.gmra.mxu2 %v896_v45 }
 0x195   : > { %v669_v48 = vpop.f32.mrf.mxu2 }
 0x196   : > { %v670_v49 = vadd.f32 %v669_v48, %v1805_v22  ;;  %1061 = vmatmul.f32.gmra.mxu3 %v899_v47  ;;  %v734_v50 = vpop.f32.mrf.mxu3 }
 0x197   : > { %v802_v51 = vpop.f32.mrf.mxu0 }
 0x198   : > { %v735_v52 = vadd.f32 %v734_v50, %v670_v49  ;;  %v803_v53 = vadd.f32 %v802_v51, %v1802_v27  ;;  %v867_v54 = vpop.f32.mrf.mxu1 }
 0x19a   : > { %v898_v55 = vmax.f32 %v735_v52, 0.0  ;;  %v868_v56 = vadd.f32 %v867_v54, %v803_v53 }
 0x19c   : > { %v901_v57 = vmax.f32 %v868_v56, 0.0  ;;  %996 = vmatmul.f32.gmra.mxu2 %v898_v55 }
 0x19d   : > { %v672_v58 = vpop.f32.mrf.mxu2 }
 0x19e   : > { %v673_v59 = vadd.f32 %v672_v58, %v1805_v22  ;;  %1064 = vmatmul.f32.gmra.mxu3 %v901_v57  ;;  %v737_v60 = vpop.f32.mrf.mxu3 }
 0x1a0   : > { %v738_v61 = vadd.f32 %v737_v60, %v673_v59 }
 0x1a2   : > { %v900_v62 = vmax.f32 %v738_v61, 0.0 }
 0x1a3   : > { %v1020_v1 = vpop.f32.mrf.mxu1 }
 0x1a4   : > { %999 = vmatmul.f32.gmra.mxu2 %v900_v62 }
 0x1a9   : > { %v955_v27 = vpop.f32.mrf.mxu0 }
 0x1aa   : > { %v956_v0 = vadd.f32 %v1842_v63, %v955_v27 }
 0x1ac   : > { %v1021_v2 = vadd.f32 %v1020_v1, %v956_v0 }
 0x1ae   : > { %1068 = vst [vmem:[%s1847_s18] sm:$0xff] %v1021_v2 }
 0x1b1   : > { %v1023_v22 = vpop.f32.mrf.mxu3 }
 0x1b7   : > { %v958_v3 = vpop.f32.mrf.mxu2 }
 0x1b8   : > { %v959_v4 = vadd.f32 %v1842_v63, %v958_v3 }
 0x1b9   : > { %v1026_v5 = vpop.f32.mrf.mxu3 }
 0x1ba   : > { %v1024_v6 = vadd.f32 %v1023_v22, %v959_v4 }
 0x1bc   : > { %1069 = vst [vmem:[%s1847_s18 + $0x8] sm:$0xff] %v1024_v6 }
 0x1bf   : > { %v961_v7 = vpop.f32.mrf.mxu2 }
 0x1c0   : > { %v962_v8 = vadd.f32 %v1842_v63, %v961_v7 }
 0x1c1   : > { %v1029_v9 = vpop.f32.mrf.mxu3 }
 0x1c2   : > { %v1027_v10 = vadd.f32 %v1026_v5, %v962_v8 }
 0x1c4   : > { %1070 = vst [vmem:[%s1847_s18 + $0x10] sm:$0xff] %v1027_v10 }
 0x1c7   : > { %v964_v11 = vpop.f32.mrf.mxu2 }
 0x1c8   : > { %v965_v12 = vadd.f32 %v1842_v63, %v964_v11 }
 0x1c9   : > { %v1032_v13 = vpop.f32.mrf.mxu3 }
 0x1ca   : > { %v1030_v14 = vadd.f32 %v1029_v9, %v965_v12 }
 0x1cc   : > { %1071 = vst [vmem:[%s1847_s18 + $0x18] sm:$0xff] %v1030_v14 }
 0x1cf   : > { %v967_v15 = vpop.f32.mrf.mxu2 }
 0x1d0   : > { %v968_v16 = vadd.f32 %v1842_v63, %v967_v15 }
 0x1d1   : > { %v1035_v17 = vpop.f32.mrf.mxu3 }
 0x1d2   : > { %v1033_v18 = vadd.f32 %v1032_v13, %v968_v16 }
 0x1d4   : > { %1072 = vst [vmem:[%s1847_s18 + $0x20] sm:$0xff] %v1033_v18 }
 0x1d7   : > { %v970_v19 = vpop.f32.mrf.mxu2 }
 0x1d8   : > { %v971_v20 = vadd.f32 %v1842_v63, %v970_v19 }
 0x1d9   : > { %v1038_v21 = vpop.f32.mrf.mxu3 }
 0x1da   : > { %v1036_v24 = vadd.f32 %v1035_v17, %v971_v20 }
 0x1dc   : > { %1073 = vst [vmem:[%s1847_s18 + $0x28] sm:$0xff] %v1036_v24 }
 0x1df   : > { %v973_v25 = vpop.f32.mrf.mxu2 }
 0x1e0   : > { %v974_v26 = vadd.f32 %v1842_v63, %v973_v25 }
 0x1e1   : > { %v1041_v28 = vpop.f32.mrf.mxu3 }
 0x1e2   : > { %v1039_v29 = vadd.f32 %v1038_v21, %v974_v26 }
 0x1e4   : > { %1074 = vst [vmem:[%s1847_s18 + $0x30] sm:$0xff] %v1039_v29 }
 0x1e7   : > { %v976_v30 = vpop.f32.mrf.mxu2 }
 0x1e8   : > { %v977_v31 = vadd.f32 %v1842_v63, %v976_v30 }
 0x1e9   : > { %v1044_v23 = vpop.f32.mrf.mxu3 }
 0x1ea   : > { %v1042_v32 = vadd.f32 %v1041_v28, %v977_v31 }
 0x1ec   : > { %1075 = vst [vmem:[%s1847_s18 + $0x38] sm:$0xff] %v1042_v32 }
 0x1ef   : > { %v979_v33 = vpop.f32.mrf.mxu2 }
 0x1f0   : > { %v980_v34 = vadd.f32 %v1842_v63, %v979_v33 }
 0x1f1   : > { %v1047_v35 = vpop.f32.mrf.mxu3 }
 0x1f2   : > { %v1045_v36 = vadd.f32 %v1044_v23, %v980_v34 }
 0x1f4   : > { %1076 = vst [vmem:[%s1847_s18 + $0x40] sm:$0xff] %v1045_v36 }
 0x1f7   : > { %v982_v37 = vpop.f32.mrf.mxu2 }
 0x1f8   : > { %v983_v38 = vadd.f32 %v1842_v63, %v982_v37 }
 0x1f9   : > { %v1050_v39 = vpop.f32.mrf.mxu3 }
 0x1fa   : > { %v1048_v40 = vadd.f32 %v1047_v35, %v983_v38 }
 0x1fc   : > { %1077 = vst [vmem:[%s1847_s18 + $0x48] sm:$0xff] %v1048_v40 }
 0x1ff   : > { %v985_v41 = vpop.f32.mrf.mxu2 }
 0x200   : > { %v986_v42 = vadd.f32 %v1842_v63, %v985_v41 }
 0x201   : > { %v1053_v43 = vpop.f32.mrf.mxu3 }
 0x202   : > { %v1051_v44 = vadd.f32 %v1050_v39, %v986_v42 }
 0x204   : > { %1078 = vst [vmem:[%s1847_s18 + $0x50] sm:$0xff] %v1051_v44 }
 0x207   : > { %v988_v45 = vpop.f32.mrf.mxu2 }
 0x208   : > { %v989_v46 = vadd.f32 %v1842_v63, %v988_v45 }
 0x209   : > { %v1056_v48 = vpop.f32.mrf.mxu3 }
 0x20a   : > { %v1054_v47 = vadd.f32 %v1053_v43, %v989_v46 }
 0x20c   : > { %1079 = vst [vmem:[%s1847_s18 + $0x58] sm:$0xff] %v1054_v47 }
 0x20f   : > { %v991_v49 = vpop.f32.mrf.mxu2 }
 0x210   : > { %v992_v50 = vadd.f32 %v1842_v63, %v991_v49 }
 0x211   : > { %v1059_v52 = vpop.f32.mrf.mxu3 }
 0x212   : > { %v1057_v51 = vadd.f32 %v1056_v48, %v992_v50 }
 0x214   : > { %1080 = vst [vmem:[%s1847_s18 + $0x60] sm:$0xff] %v1057_v51 }
 0x217   : > { %v994_v53 = vpop.f32.mrf.mxu2 }
 0x218   : > { %v995_v54 = vadd.f32 %v1842_v63, %v994_v53 }
 0x219   : > { %v1062_v56 = vpop.f32.mrf.mxu3 }
 0x21a   : > { %v1060_v55 = vadd.f32 %v1059_v52, %v995_v54 }
 0x21c   : > { %1081 = vst [vmem:[%s1847_s18 + $0x68] sm:$0xff] %v1060_v55 }
 0x21f   : > { %v997_v57 = vpop.f32.mrf.mxu2 }
 0x220   : > { %v998_v58 = vadd.f32 %v1842_v63, %v997_v57 }
 0x221   : > { %v1065_v62 = vpop.f32.mrf.mxu3 }
 0x222   : > { %v1063_v59 = vadd.f32 %v1062_v56, %v998_v58 }
 0x224   : > { %1082 = vst [vmem:[%s1847_s18 + $0x70] sm:$0xff] %v1063_v59 }
 0x227   : > { %v1000_v60 = vpop.f32.mrf.mxu2 }
 0x228   : > { %v1001_v61 = vadd.f32 %v1842_v63, %v1000_v60 }
 0x22a   : > { %v1066_v27 = vadd.f32 %v1065_v62, %v1001_v61 }
 0x22c   : > { %1083 = vst [vmem:[%s1847_s18 + $0x78] sm:$0xff] %v1066_v27 }
 0x22d   : > { %1367 = shalt.err (!%p1364_p8)
}
 0x22e   : > { %s1411_s14 = smov 128   ;;  %s1412_s18 = smov 8  }
 0x22f   : > { %1259 = dma.vmem_to_hbm [thread:$0]  (%p1491_p5), %s1098_s23, 2048, %s1100_s29, %s1085_s8, %s1411_s14, %s1411_s14, %s1412_s18  }
 0x230 PF: > { %p1271_p9 = scmp.ge.s32.totalorder %s1406_s27, 2  ;;  %s1114_s20 = sand.u32 1, %s1394_s24  }
 0x231   : > { %s1115_s21 = scalar_lea.sflag [#allocation4], %s1114_s20 }
 0x232   : > { %p1266_p10 = pnand %p1271_p9, %p1495_p6 }
 0x234   : > { %p1267_p11 = pneg %p1266_p10 }
 0x236   : > { %1389 = dma.done.wait (%p1267_p11), %s1115_s21, 2048  }
 0x237   : > { %1391 = vsyncadd (%p1267_p11), %s1115_s21, 4294965248  ;;  %p18_p12 = scmp.ge.s32.totalorder %s1478_s30, 6   ;;  %s1924_s24 = smov %s1398_s25 }
 0x238   : > { %s1925_s25 = smov %s1402_s26  ;;  %s1926_s26 = smov %s1489_s10 }
 0x239   : > { %s1927_s27 = smov %s1478_s30  ;;  %20 = sbr.rel (!%p18_p12) target bundleno = 4 (0x4), region = 88 }
 0x23e   :  { %1121 = vsyncpa [#allocation3], 1 }
 0x23f   :  { %1123 = vsyncpa [#allocation3 + $0x1], 1 }
 0x240   :  { %1124 = vsyncpa [#allocation4], 1 }
 0x241   :  { %1126 = vsyncpa [#allocation4 + $0x1], 1 }

</bundles_post_ra>
